<compile_context>
chip_gen: v6e
topology: v6e:2x2x1
jax: 0.10.0
libtpu: 0.0.40
codegen_flags: <defaults>
</compile_context>

<pallas_src>
import functools

import jax
import jax.numpy as jnp
from jax.experimental import pallas as pl
from jax.experimental.pallas import tpu as pltpu

LANE = 128


def _add_alpha_kernel(x1_ref, x2_ref, o_ref, *, alpha):
    # out = x1 + alpha * x2 ; alpha is an immediate cast to the output dtype so
    # the FMA stays entirely in the input dtype (no f32 promotion of the store).
    a = jnp.asarray(alpha, dtype=o_ref.dtype)
    o_ref[...] = x1_ref[...] + a * x2_ref[...]


def _add_alpha_2d(x1f, x2f, alpha, *, target_block_bytes, vmem_limit_bytes):
    """Run the kernel on lane-dense (rows, 128) slabs."""
    rows = x1f.shape[0]
    itemsize = jnp.dtype(x1f.dtype).itemsize
    # Native sublane multiple per dtype (f32: 8, bf16/f16: 16, int8/fp8: 32).
    sublane = max(8, 32 // itemsize)

    # Target block rows: ~target_block_bytes per input, multiple of sublane.
    tr_target = max(
        sublane, (target_block_bytes // (LANE * itemsize)) // sublane * sublane
    )

    if rows < sublane:
        # Block == full array dims (legal even when not (8,128)-divisible).
        tr = rows
    else:
        # (8,128)-aligned blocks; Pallas masks a partial last block, so we never
        # need a single-full-extent fallback (which risked VMEM OOM).
        tr = min(tr_target, (rows // sublane) * sublane)
        if pl.cdiv(rows, tr) < 2 and rows >= 2 * sublane:
            # Ensure >=2 grid steps: shards across v7x's two TensorCores and
            # keeps double-buffered DMA/compute overlap alive.
            half = pl.cdiv(rows, 2 * sublane) * sublane
            tr = max(sublane, min(tr, half))
    grid = (pl.cdiv(rows, tr),)

    n = rows * LANE
    return pl.pallas_call(
        functools.partial(_add_alpha_kernel, alpha=alpha),
        out_shape=jax.ShapeDtypeStruct((rows, LANE), x1f.dtype),
        grid_spec=pltpu.PrefetchScalarGridSpec(
            num_scalar_prefetch=0,
            grid=grid,
            in_specs=[
                pl.BlockSpec((tr, LANE), lambda i: (i, 0)),
                pl.BlockSpec((tr, LANE), lambda i: (i, 0)),
            ],
            out_specs=pl.BlockSpec((tr, LANE), lambda i: (i, 0)),
        ),
        compiler_params=pltpu.CompilerParams(
            dimension_semantics=("parallel",),
            vmem_limit_bytes=vmem_limit_bytes,
        ),
        cost_estimate=pl.CostEstimate(
            flops=2 * n, transcendentals=0, bytes_accessed=3 * n * itemsize
        ),
    )(x1f, x2f)


def add_alpha(
    x1,
    x2,
    alpha=0.5,
    *,
    target_block_bytes=4 * 1024 * 1024,
    vmem_limit_bytes=32 * 1024 * 1024,
    min_pallas_bytes=1 * 1024 * 1024,
):
    assert x1.shape == x2.shape and x1.dtype == x2.dtype
    orig_shape = x1.shape
    n = x1.size
    itemsize = jnp.dtype(x1.dtype).itemsize

    # alpha is a construction-time constant in the ADD module -> compile-time
    # immediate (cast to the tensor dtype so output dtype never promotes).
    alpha_const = float(alpha)
    a = jnp.asarray(alpha_const, dtype=x1.dtype)

    # Small inputs: skip Pallas (fusion barrier + ~0.35us/step launch cost);
    # plain XLA elementwise is strictly cheaper and can fuse with neighbors.
    if n * itemsize < min_pallas_bytes or n < LANE:
        return x1 + a * x2

    kernel = functools.partial(
        _add_alpha_2d,
        alpha=alpha_const,
        target_block_bytes=target_block_bytes,
        vmem_limit_bytes=vmem_limit_bytes,
    )

    if n % LANE == 0:
        # Zero-copy lane-dense reshape; no pad, no output slice.
        rows = n // LANE
        out = kernel(x1.reshape(rows, LANE), x2.reshape(rows, LANE))
        return out.reshape(orig_shape)

    # Unaligned size: kernel on the largest 128-aligned prefix, tiny tail in
    # plain jnp (much cheaper than padding both inputs + slicing the output).
    n_main = (n // LANE) * LANE
    rows = n_main // LANE
    x1_flat = x1.reshape(-1)
    x2_flat = x2.reshape(-1)
    out_main = kernel(
        x1_flat[:n_main].reshape(rows, LANE),
        x2_flat[:n_main].reshape(rows, LANE),
    ).reshape(-1)
    tail = x1_flat[n_main:] + a * x2_flat[n_main:]
    return jnp.concatenate([out_main, tail]).reshape(orig_shape)


if __name__ == "__main__":
    key = jax.random.PRNGKey(0)
    k1, k2, k3, k4 = jax.random.split(key, 4)
    alpha = 0.5

    # x is a pair of NCHW tensors, as the module's forward expects.
    x1 = jax.random.normal(k1, (2, 4, 16, 16), dtype=jnp.float32)
    x2 = jax.random.normal(k2, (2, 4, 16, 16), dtype=jnp.float32)
    ref = x1 + alpha * x2

    # 1) Default path for the tiny YOLO shape (plain-JAX bypass).
    y = jax.block_until_ready(add_alpha(x1, x2, alpha))
    assert y.shape == ref.shape
    assert jnp.allclose(y, ref, atol=1e-6, rtol=1e-6)

    # 2) Same shape forced through the Pallas kernel (multi-step grid).
    y = jax.block_until_ready(add_alpha(x1, x2, alpha, min_pallas_bytes=0))
    assert y.shape == ref.shape
    assert jnp.allclose(y, ref, atol=1e-6, rtol=1e-6)

    # 3) Larger 128-aligned tensor hitting the tiled pipelined grid.
    a1 = jax.random.normal(k3, (2, 64, 64, 64), dtype=jnp.float32)
    a2 = jax.random.normal(k4, (2, 64, 64, 64), dtype=jnp.float32)
    y = jax.block_until_ready(add_alpha(a1, a2, alpha))
    assert jnp.allclose(y, a1 + alpha * a2, atol=1e-6, rtol=1e-6)

    # 4) Non-multiple-of-128 size: 128-aligned prefix in-kernel + jnp tail.
    b1 = jax.random.normal(k3, (3, 5, 17, 19), dtype=jnp.float32)
    b2 = jax.random.normal(k4, (3, 5, 17, 19), dtype=jnp.float32)
    y = jax.block_until_ready(add_alpha(b1, b2, alpha, min_pallas_bytes=0))
    assert y.shape == b1.shape
    assert jnp.allclose(y, b1 + alpha * b2, atol=1e-6, rtol=1e-6)

    print("KERNEL_OK")
</pallas_src>

<mosaic_0001>
module attributes {stable_mosaic.version = 11 : i64} {
  func.func @_add_alpha_kernel(%arg0: i32, %arg1: memref<8x128xf32, #tpu.memory_space<vmem>>, %arg2: memref<8x128xf32, #tpu.memory_space<vmem>>, %arg3: memref<8x128xf32, #tpu.memory_space<vmem>>) attributes {dimension_semantics = [#tpu.dimension_semantics<parallel>], iteration_bounds = array<i64: 2>, scalar_prefetch = 0 : i64, scratch_operands = 0 : i64, tpu.core_type = #tpu.core_type<tc>, window_params = [{transform_indices = @transform_0, window_bounds = array<i64: 8, 128>}, {transform_indices = @transform_1, window_bounds = array<i64: 8, 128>}, {transform_indices = @transform_2, window_bounds = array<i64: 8, 128>}]} {
    %c0 = arith.constant 0 : index
    %c0_0 = arith.constant 0 : index
    %0 = vector.load %arg1[%c0, %c0_0] : memref<8x128xf32, #tpu.memory_space<vmem>>, vector<8x128xf32>
    %c0_1 = arith.constant 0 : index
    %c0_2 = arith.constant 0 : index
    %1 = vector.load %arg2[%c0_1, %c0_2] : memref<8x128xf32, #tpu.memory_space<vmem>>, vector<8x128xf32>
    %cst = arith.constant 5.000000e-01 : f32
    %2 = vector.broadcast %cst : f32 to vector<8x128xf32>
    %3 = arith.mulf %2, %1 : vector<8x128xf32>
    %4 = arith.addf %0, %3 : vector<8x128xf32>
    %c0_3 = arith.constant 0 : index
    %c0_4 = arith.constant 0 : index
    %5 = vector.load %arg3[%c0_3, %c0_4] : memref<8x128xf32, #tpu.memory_space<vmem>>, vector<8x128xf32>
    tpu.vector_store %arg3[%c0_3, %c0_4], %4 {strides = array<i32>} : memref<8x128xf32, #tpu.memory_space<vmem>>, vector<8x128xf32>,
    return
  }
  func.func @transform_0(%arg0: i32) -> (i32, i32) {
    %c0_i32 = arith.constant 0 : i32
    %c0_i32_0 = arith.constant 0 : i32
    return %arg0, %c0_i32 : i32, i32
  }
  func.func @transform_1(%arg0: i32) -> (i32, i32) {
    %c0_i32 = arith.constant 0 : i32
    %c0_i32_0 = arith.constant 0 : i32
    return %arg0, %c0_i32 : i32, i32
  }
  func.func @transform_2(%arg0: i32) -> (i32, i32) {
    %c0_i32 = arith.constant 0 : i32
    %c0_i32_0 = arith.constant 0 : i32
    return %arg0, %c0_i32 : i32, i32
  }
}

</mosaic_0001>

<bundles_post_ra>
// kernel: tpu_custom_call.1
= control target key start
LH: loop header
LB: loop body
LE: loop exit
PB: predicated region body
PF: predicated region fallthrough
CT: control target
= control target key end

     0   :  { %7 = vsyncpa [#allocation3], 0  ;;  %s712_s0 = inlined_call_operand.hbm [shape: f32[16,128], index: 0, kind: input, shape index: {}]   ;;  %s713_s1 = inlined_call_operand.hbm [shape: f32[16,128], index: 1, kind: input, shape index: {}]   ;;  %s714_s2 = inlined_call_operand.hbm [shape: f32[16,128], index: 2, kind: output, shape index: {}]  }
   0x1   :  { %9 = vsyncpa [#allocation3 + $0x1], 0 }
   0x2   :  { %10 = vsyncpa [#allocation6], 0 }
   0x3   :  { %12 = vsyncpa [#allocation6 + $0x1], 0 }
   0x4   :  { %13 = vsyncpa [#allocation4], 0 }
   0x5   :  { %15 = vsyncpa [#allocation4 + $0x1], 0  ;;  %s518_s9 = smov 0   ;;  %s520_s10 = smov 0  }
   0x6   :  { %s522_s11 = smov 0   ;;  %s524_s12 = smov 0  }
   0x7 LB: > { %s539_s13 = sadd.s32 4294967295, %s498_s12   ;;  %s308_s14 = sadd.s32 4294967294, %s498_s12   ;;  %s498_s12 = sphi %s524_s12, %s733_s12   ;;  %s494_s11 = sphi %s522_s11, %s732_s11   ;;  %s490_s10 = sphi %s520_s10, %s731_s10   ;;  %s486_s9 = sphi %s518_s9, %s730_s9  }
   0x8   : > { %s543_s15 = sadd.s32 1, %s498_s12   ;;  %s28_s16 = sadd.s32 1, %s494_s11 }
   0x9   : > { %s25_s17 = ssub.s32 %s498_s12, %s543_s15  ;;  %p35_p0 = scmp.ne.s32.totalorder %s494_s11, %s490_s10 }
   0xa   : > { %p26_p1 = scmp.eq.s32.totalorder %s25_s17, 0  ;;  %p36_p2 = scmp.eq.s32.totalorder %s498_s12, 0 }
   0xb   : > { %p41_p3 = scmp.ne.s32.totalorder %s490_s10, %s486_s9  ;;  %p42_p4 = scmp.eq.s32.totalorder %s539_s13, 0 }
   0xc   : > { %s555_s18 = scalar_select %p26_p1, %s494_s11, %s28_s16  }
   0xd   : > { %p557_p5 = por %p36_p2, %p35_p0  ;;  %p561_p6 = por %p42_p4, %p41_p3 }
   0xe   : > { %p91_p7 = scmp.eq.s32.totalorder %s539_s13, 1  ;;  %p97_p8 = scmp.eq.s32.totalorder %s308_s14, 1 }
   0xf   : > { %s718_s20 = scalar_select %p561_p6, 1, 0 }
  0x10   : > { %p340_p10 = scmp.lt.s32.totalorder %s498_s12, 2  ;;  %p568_p11 = por %p91_p7, %p35_p0 }
  0x11   : > { %p572_p12 = por %p97_p8, %p41_p3  ;;  %s577_s23 = sand.u32 1, %s494_s11  }
  0x12   : > { %s719_s21 = scalar_select %p568_p11, 1, 0 }
  0x13   : > { %s720_s22 = scalar_select %p572_p12, 1, 0 }
  0x14   : > { %s312_s24 = sshll.u32 %s498_s12, 7  ;;  %s311_s25 = sshll.u32 %s577_s23, 3 }
  0x15   : > { %s586_s28 = scalar_lea.hbm %s712_s0, %s312_s24  ;;  %s121_s29 = scalar_lea.vmem [#allocation2], %s311_s25 }
  0x16   : > { %s128_s30 = sshll.u32 %s121_s29, 4  ;;  %p592_p13 = pnand %p340_p10, %p557_p5  ;;  %s596_s30 = int_to_ptr.vmem [resolvable:$true] %s128_s30 }
  0x17   : > { %s118_s4 = scalar_lea.sflag [#allocation3], %s577_s23  ;;  %s374_s5 = scalar_lea.hbm %s586_s28, 128 }
  0x18   : > { %p375_p2 = scmp.ne.s32.totalorder %s586_s28, %s374_s5  ;;  %p376_p3 = pneg %p592_p13 }
  0x19   : > { %s379_s8 = scalar_lea.hbm %s712_s0, 256  ;;  %p380_p5 = scmp.lt.s32.totalorder %s586_s28, %s712_s0 }
  0x1a   : > { %p377_p4 = pnand %p376_p3, %p375_p2  ;;  %p381_p8 = scmp.lt.s32.totalorder %s379_s8, %s374_s5 }
  0x1c   : > { %p378_p7 = pneg %p377_p4  ;;  %p382_p10 = por %p381_p8, %p380_p5 }
  0x1e   : > { %p383_p9 = pnand %p382_p10, %p378_p7 }
  0x20   : > { %386 = shalt.err (!%p383_p9)
}
  0x21   : > { %s387_s17 = scalar_lea.vmem %s596_s30, 128  ;;  %s500_s19 = smov [#allocation2]  }
  0x22   : > { %p388_p0 = scmp.ne.s32.totalorder %s596_s30, %s387_s17  ;;  %s392_s26 = sshll.u32 %s500_s19, 4  ;;  %s393_s26 = int_to_ptr.vmem [resolvable:$false] %s392_s26 }
  0x23   : > { %s394_s27 = scalar_lea.vmem %s393_s26, 256  ;;  %p395_p1 = scmp.lt.s32.totalorder %s596_s30, %s393_s26 }
  0x24   : > { %p390_p2 = pnand %p388_p0, %p376_p3  ;;  %p396_p12 = scmp.lt.s32.totalorder %s394_s27, %s387_s17 }
  0x26   : > { %p391_p4 = pneg %p390_p2  ;;  %p397_p11 = por %p396_p12, %p395_p1 }
  0x28   : > { %p398_p5 = pnand %p397_p11, %p391_p4 }
  0x2a   : > { %401 = shalt.err (!%p398_p5)
}
  0x2b   : > { %332 = dma.hbm_to_vmem [thread:$0]  (!%p592_p13), %s586_s28, 128, %s596_s30, %s118_s4  }
  0x2c   : > { %p722_p9 = scmp.lt.s32.totalorder %s498_s12, 3  ;;  %p723_p0 = scmp.ge.s32.totalorder %s498_s12, 1 }
  0x2d   : > { %s638_s7 = scalar_lea.hbm %s713_s1, %s312_s24  ;;  %s139_s8 = scalar_lea.vmem [#allocation5], %s311_s25 }
  0x2e   : > { %p629_p7 = pnand %p723_p0, %p722_p9  ;;  %s146_s14 = sshll.u32 %s139_s8, 4  ;;  %s147_s14 = int_to_ptr.vmem [resolvable:$true] %s146_s14 }
  0x2f   : > { %s136_s28 = scalar_lea.sflag [#allocation6], %s577_s23  ;;  %s402_s30 = scalar_lea.hbm %s638_s7, 128 }
  0x30   : > { %s724_s29 = scalar_select %p629_p7, 1, 0 }
  0x31   : > { %p403_p11 = scmp.ne.s32.totalorder %s638_s7, %s402_s30  ;;  %s407_s17 = scalar_lea.hbm %s713_s1, 256 }
  0x32   : > { %p408_p8 = scmp.lt.s32.totalorder %s638_s7, %s713_s1  ;;  %p409_p10 = scmp.lt.s32.totalorder %s407_s17, %s402_s30 }
  0x33   : > { %p405_p12 = pnand %p403_p11, %p376_p3 }
  0x34   : > { %p410_p2 = por %p409_p10, %p408_p8 }
  0x35   : > { %p406_p1 = pneg %p405_p12 }
  0x37   : > { %p411_p4 = pnand %p410_p2, %p406_p1 }
  0x39   : > { %414 = shalt.err (!%p411_p4)
}
  0x3a   : > { %s415_s25 = scalar_lea.vmem %s147_s14, 128  ;;  %s501_s23 = smov [#allocation5]  }
  0x3b   : > { %p416_p5 = scmp.ne.s32.totalorder %s147_s14, %s415_s25  ;;  %s420_s26 = sshll.u32 %s501_s23, 4  ;;  %s421_s26 = int_to_ptr.vmem [resolvable:$false] %s420_s26 }
  0x3c   : > { %s422_s27 = scalar_lea.vmem %s421_s26, 256  ;;  %p423_p11 = scmp.lt.s32.totalorder %s147_s14, %s421_s26 }
  0x3d   : > { %p418_p9 = pnand %p416_p5, %p376_p3  ;;  %p424_p12 = scmp.lt.s32.totalorder %s422_s27, %s415_s25 }
  0x3f   : > { %p419_p0 = pneg %p418_p9  ;;  %p425_p6 = por %p424_p12, %p423_p11 }
  0x41   : > { %p426_p7 = pnand %p425_p6, %p419_p0 }
  0x43   : > { %429 = shalt.err (!%p426_p7)
}
  0x44   : > { %335 = dma.hbm_to_vmem [thread:$0]  (!%p592_p13), %s638_s7, 128, %s147_s14, %s136_s28  }
  0x45   : > { %p725_p1 = scmp.ne.s32.totalorder %s724_s29, 0 }
  0x46   : > { %s664_s5 = sand.u32 (!%p725_p1), 1, %s490_s10   ;;  %p726_p3 = scmp.ne.s32.totalorder (!%p725_p1), %s718_s20, 0 }
  0x47   : > { %155 = sbr.rel (%p725_p1) target bundleno = 104 (0x68), region = 28  ;;  %s316_s6 = sshll.u32 (!%p725_p1), %s664_s5, 3 }
  0x48   : > { %s158_s8 = scalar_lea.sflag (!%p725_p1), [#allocation3], %s664_s5  ;;  %s161_s30 = scalar_lea.vmem (!%p725_p1), [#allocation2], %s316_s6 }
  0x4c   : > { %473 = dma.done.wait (%p726_p3), %s158_s8, 128  }
  0x4d   : > { %475 = vsyncadd (%p726_p3), %s158_s8, 4294967168  ;;  %s167_s3 = scalar_lea.sflag [#allocation6], %s664_s5  ;;  %s170_s7 = scalar_lea.vmem [#allocation5], %s316_s6 }
  0x4e   : > { %477 = dma.done.wait (%p726_p3), %s167_s3, 128  }
  0x4f   : > { %479 = vsyncadd (%p726_p3), %s167_s3, 4294967168  ;;  %v196_v0 = vld [vmem:[%s161_s30] sm:$0xff]  ;;  %v197_v1 = vld [vmem:[%s170_s7] sm:$0xff]  ;;  %s195_s29 = scalar_lea.vmem [#allocation7], %s316_s6  ;;  %s320_s28 = sshll.u32 %s539_s13, 7 }
  0x50   : > { %s215_s14 = sshll.u32 %s195_s29, 4  ;;  %v198_v2 = vmul.f32 0.5, %v197_v1  ;;  %s213_s17 = scalar_lea.hbm %s714_s2, %s320_s28  ;;  %s216_s14 = int_to_ptr.vmem [resolvable:$true] %s215_s14 }
  0x51   : > { %s202_s24 = scalar_lea.sflag [#allocation4], %s664_s5  ;;  %s430_s19 = scalar_lea.vmem %s216_s14, 128 }
  0x52   : > { %v199_v3 = vadd.f32 %v198_v2, %v196_v0  ;;  %p431_p6 = scmp.ne.s32.totalorder %s216_s14, %s430_s19  ;;  %p727_p13 = scmp.ne.s32.totalorder %s719_s21, 0 }
  0x53   : > { %s502_s20 = smov [#allocation7]  }
  0x54   : > { %200 = vst [vmem:[%s195_s29] sm:$0xff] %v199_v3  ;;  %p432_p7 = pnand %p431_p6, %p727_p13  ;;  %s434_s25 = sshll.u32 %s502_s20, 4  ;;  %s435_s25 = int_to_ptr.vmem [resolvable:$false] %s434_s25 }
  0x55   : > { %s436_s23 = scalar_lea.vmem %s435_s25, 256  ;;  %p437_p10 = scmp.lt.s32.totalorder %s216_s14, %s435_s25 }
  0x56   : > { %p433_p8 = pneg %p432_p7  ;;  %p438_p2 = scmp.lt.s32.totalorder %s436_s23, %s430_s19 }
  0x58   : > { %p439_p4 = por %p438_p2, %p437_p10 }
  0x5a   : > { %p440_p5 = pnand %p439_p4, %p433_p8 }
  0x5c   : > { %443 = shalt.err (!%p440_p5)
}
  0x5d   : > { %s444_s13 = scalar_lea.hbm %s213_s17, 128  ;;  %s448_s5 = scalar_lea.hbm %s714_s2, 256 }
  0x5e   : > { %p445_p9 = scmp.ne.s32.totalorder %s213_s17, %s444_s13  ;;  %p449_p12 = scmp.lt.s32.totalorder %s213_s17, %s714_s2 }
  0x5f   : > { %p450_p1 = scmp.lt.s32.totalorder %s448_s5, %s444_s13 }
  0x60   : > { %p446_p0 = pnand %p445_p9, %p727_p13 }
  0x61   : > { %p451_p3 = por %p450_p1, %p449_p12 }
  0x62   : > { %p447_p11 = pneg %p446_p0 }
  0x64   : > { %p452_p6 = pnand %p451_p3, %p447_p11 }
  0x66   : > { %455 = shalt.err (!%p452_p6)
}
  0x67   : > { %327 = dma.vmem_to_hbm [thread:$0]  (%p727_p13), %s216_s14, 128, %s213_s17, %s202_s24  }
  0x68 PF: > { %s227_s30 = sand.u32 1, %s486_s9   ;;  %p728_p7 = scmp.ne.s32.totalorder %s720_s22, 0 }
  0x69   : > { %p729_p8 = scmp.ge.s32.totalorder %s498_s12, 2  ;;  %s228_s3 = scalar_lea.sflag [#allocation4], %s227_s30 }
  0x6b   : > { %p337_p10 = pnand %p729_p8, %p728_p7 }
  0x6d   : > { %p338_p2 = pneg %p337_p10 }
  0x6f   : > { %481 = dma.done.wait (%p338_p2), %s228_s3, 128  }
  0x70   : > { %483 = vsyncadd (%p338_p2), %s228_s3, 4294967168  ;;  %p18_p4 = scmp.ge.s32.totalorder %s543_s15, 4   ;;  %s730_s9 = smov %s490_s10 }
  0x71   : > { %s731_s10 = smov %s494_s11  ;;  %s732_s11 = smov %s555_s18 }
  0x72   : > { %s733_s12 = smov %s543_s15  ;;  %20 = sbr.rel (!%p18_p4) target bundleno = 7 (0x7), region = 86 }
  0x77   :  { %233 = vsyncpa [#allocation3], 1 }
  0x78   :  { %235 = vsyncpa [#allocation3 + $0x1], 1 }
  0x79   :  { %236 = vsyncpa [#allocation6], 1 }
  0x7a   :  { %238 = vsyncpa [#allocation6 + $0x1], 1 }
  0x7b   :  { %239 = vsyncpa [#allocation4], 1 }
  0x7c   :  { %241 = vsyncpa [#allocation4 + $0x1], 1 }

</bundles_post_ra>
